<compile_context>
chip_gen: v6e
topology: v6e:2x2x1
jax: 0.10.0
libtpu: 0.0.40
codegen_flags: <defaults>
</compile_context>

<pallas_src>
import jax
import jax.numpy as jnp
from jax.experimental import pallas as pl
from jax.experimental.pallas import tpu as pltpu

FEATURES = 32                    # d_model of the provided LayerNorm
EPS = 1e-6
PACK = 128 // FEATURES           # 4 feature rows packed per 128-lane vreg row
DEFAULT_ROW_TILE = 4096          # packed rows per grid step (2 MiB f32 per block)
VMEM_LIMIT_BYTES = 32 * 1024 * 1024   # fits v5e/v6e (128 MiB) and v7x (64 MiB) physical VMEM


def _round_up(a: int, b: int) -> int:
    return (a + b - 1) // b * b


def _layernorm_kernel(x_ref, g_ref, b_ref, seg_ref, o_ref):
    # x_ref/o_ref: (tile, 128) lane-dense blocks (unmasked 128-wide loads/stores).
    # g_ref/b_ref: (1, 128), gamma/beta tiled PACK times along lanes (f32).
    # seg_ref:     (128, 128) block-diagonal ones (4 blocks of 32x32), f32.
    x = x_ref[...].astype(jnp.float32)                      # (T, 128)
    seg = seg_ref[...]                                      # (128, 128)

    # Per-32-lane-segment sums on the (otherwise idle) MXU; the result is
    # already broadcast across each segment, so everything stays lane-dense.
    sums = jnp.dot(x, seg, preferred_element_type=jnp.float32)
    mean = sums * (1.0 / FEATURES)
    xc = x - mean                                           # two-pass (centered) variance
    sumsq = jnp.dot(xc * xc, seg, preferred_element_type=jnp.float32)
    std = jnp.sqrt(sumsq * (1.0 / (FEATURES - 1)))          # unbiased, like torch.std
    # Module divides by (std + eps): exact reciprocal for parity with torch
    # (free — the kernel is memory-bound).
    inv = pl.reciprocal(std + EPS, approx=False)
    o_ref[...] = (xc * inv * g_ref[...] + b_ref[...]).astype(o_ref.dtype)


def layer_norm(x, gamma, beta, row_tile=DEFAULT_ROW_TILE):
    """LayerNorm over the last axis. x: (..., FEATURES); gamma/beta: (FEATURES,)."""
    orig_shape = x.shape
    d = orig_shape[-1]
    assert d == FEATURES, f"expected feature dim {FEATURES}, got {d}"
    x2 = x.reshape(-1, d)
    n_rows = x2.shape[0]

    # Pack PACK feature-rows per 128-lane row (metadata-only row-major reshape).
    packed_rows = -(-n_rows // PACK)

    # Tile: big enough to amortize the ~0.35us/step grid overhead, small enough
    # that (a) the grid has >= 2 steps so both v7x TensorCores get work and
    # (b) the VMEM footprint stays within every generation's budget.
    half = -(-packed_rows // 2)
    tile = min(row_tile, _round_up(half, 16))               # 16: bf16-sublane safe

    # Only pad when rows don't pack evenly (<= 3 rows) or the whole input is
    # smaller than one tile (tiny inputs); otherwise no extra HBM round trip —
    # the partial last block is masked by Pallas (rows are independent, so
    # garbage rows never contaminate valid rows, and their writes are dropped).
    padded_rows = max(packed_rows, tile)
    pad = padded_rows * PACK - n_rows
    if pad:
        x2 = jnp.pad(x2, ((0, pad), (0, 0)))
    xp = x2.reshape(padded_rows, PACK * d)

    gp = jnp.tile(gamma.reshape(1, d).astype(jnp.float32), (1, PACK))   # (1, 128)
    bp = jnp.tile(beta.reshape(1, d).astype(jnp.float32), (1, PACK))    # (1, 128)

    # Block-diagonal ones matrix selecting each 32-lane segment.
    seg_ids = jnp.arange(PACK * d, dtype=jnp.int32) // d
    seg = (seg_ids[:, None] == seg_ids[None, :]).astype(jnp.float32)    # (128, 128)

    grid = pl.cdiv(padded_rows, tile)

    out = pl.pallas_call(
        _layernorm_kernel,
        out_shape=jax.ShapeDtypeStruct((padded_rows, PACK * d), x.dtype),
        grid_spec=pl.GridSpec(
            grid=(grid,),
            in_specs=[
                pl.BlockSpec((tile, PACK * d), lambda i: (i, 0)),
                pl.BlockSpec((1, PACK * d), lambda i: (0, 0)),
                pl.BlockSpec((1, PACK * d), lambda i: (0, 0)),
                pl.BlockSpec((PACK * d, PACK * d), lambda i: (0, 0)),
            ],
            out_specs=pl.BlockSpec((tile, PACK * d), lambda i: (i, 0)),
        ),
        compiler_params=pltpu.CompilerParams(
            dimension_semantics=("parallel",),     # shards grid across v7x's 2 TCs
            vmem_limit_bytes=VMEM_LIMIT_BYTES,
        ),
    )(xp, gp, bp, seg)

    if pad:
        y = out.reshape(padded_rows * PACK, d)[:n_rows]
    else:
        y = out.reshape(n_rows, d)
    return y.reshape(orig_shape)


def _layer_norm_ref(x, gamma, beta):
    mean = jnp.mean(x, axis=-1, keepdims=True)
    std = jnp.std(x, axis=-1, keepdims=True, ddof=1)        # unbiased, like torch.std
    return gamma * (x - mean) / (std + EPS) + beta


if __name__ == "__main__":
    key = jax.random.PRNGKey(0)
    kx, kx2, kx3, kg, kb = jax.random.split(key, 5)

    batch, seq, features = 2, 8, FEATURES
    x = jax.random.normal(kx, (batch, seq, features), dtype=jnp.float32)

    # Module-faithful parameter init: gamma = ones, beta = zeros.
    gamma = jnp.ones((features,), dtype=jnp.float32)
    beta = jnp.zeros((features,), dtype=jnp.float32)

    y = jax.block_until_ready(layer_norm(x, gamma, beta))
    assert y.shape == x.shape and y.dtype == x.dtype
    assert jnp.allclose(y, _layer_norm_ref(x, gamma, beta), atol=5e-3, rtol=5e-3)

    # Non-trivial gamma/beta: validates the 4x lane tiling of the parameters.
    gamma2 = 1.0 + 0.1 * jax.random.normal(kg, (features,), dtype=jnp.float32)
    beta2 = 0.1 * jax.random.normal(kb, (features,), dtype=jnp.float32)
    y2 = jax.block_until_ready(layer_norm(x, gamma2, beta2))
    assert jnp.allclose(y2, _layer_norm_ref(x, gamma2, beta2), atol=5e-3, rtol=5e-3)

    # Row count not a multiple of PACK: exercises the small-pad path.
    x_odd = jax.random.normal(kx2, (3, 7, features), dtype=jnp.float32)
    y3 = jax.block_until_ready(layer_norm(x_odd, gamma2, beta2))
    assert y3.shape == x_odd.shape
    assert jnp.allclose(y3, _layer_norm_ref(x_odd, gamma2, beta2), atol=5e-3, rtol=5e-3)

    # grid >= 2 with a masked partial last block and NO wrapper-side padding
    # (244 rows -> 61 packed rows, tile 32 -> blocks of 32 and 29).
    x_big = jax.random.normal(kx3, (4, 61, features), dtype=jnp.float32)
    y4 = jax.block_until_ready(layer_norm(x_big, gamma2, beta2))
    assert y4.shape == x_big.shape
    assert jnp.allclose(y4, _layer_norm_ref(x_big, gamma2, beta2), atol=5e-3, rtol=5e-3)

    print("KERNEL_OK")
</pallas_src>

<mosaic_0001>
module attributes {stable_mosaic.version = 11 : i64} {
  func.func @_layernorm_kernel(%arg0: i32, %arg1: memref<16x128xf32, #tpu.memory_space<vmem>>, %arg2: memref<1x128xf32, #tpu.memory_space<vmem>>, %arg3: memref<1x128xf32, #tpu.memory_space<vmem>>, %arg4: memref<128x128xf32, #tpu.memory_space<vmem>>, %arg5: memref<16x128xf32, #tpu.memory_space<vmem>>) attributes {dimension_semantics = [#tpu.dimension_semantics<parallel>], iteration_bounds = array<i64: 1>, scalar_prefetch = 0 : i64, scratch_operands = 0 : i64, tpu.core_type = #tpu.core_type<tc>, window_params = [{transform_indices = @transform_0, window_bounds = array<i64: 16, 128>}, {pipeline_mode = #tpu.pipeline_mode<synchronous>, transform_indices = @transform_1, window_bounds = array<i64: 1, 128>}, {pipeline_mode = #tpu.pipeline_mode<synchronous>, transform_indices = @transform_2, window_bounds = array<i64: 1, 128>}, {pipeline_mode = #tpu.pipeline_mode<synchronous>, transform_indices = @transform_3, window_bounds = array<i64: 128, 128>}, {transform_indices = @transform_4, window_bounds = array<i64: 16, 128>}]} {
    %c0 = arith.constant 0 : index
    %c0_0 = arith.constant 0 : index
    %0 = vector.load %arg1[%c0, %c0_0] : memref<16x128xf32, #tpu.memory_space<vmem>>, vector<16x128xf32>
    %c0_1 = arith.constant 0 : index
    %c0_2 = arith.constant 0 : index
    %1 = vector.load %arg4[%c0_1, %c0_2] : memref<128x128xf32, #tpu.memory_space<vmem>>, vector<128x128xf32>
    %cst = arith.constant dense<0.000000e+00> : vector<16x128xf32>
    %2 = tpu.matmul %0, %1, %cst {dimension_numbers = #tpu.dot_dimension_numbers<[1], [0], [0], [1], [0, 0, 1, 1], [], []>} : vector<16x128xf32>, vector<128x128xf32>, vector<16x128xf32> -> vector<16x128xf32>
    %cst_3 = arith.constant 3.125000e-02 : f32
    %3 = vector.broadcast %cst_3 : f32 to vector<16x128xf32>
    %4 = arith.mulf %2, %3 : vector<16x128xf32>
    %5 = arith.subf %0, %4 : vector<16x128xf32>
    %6 = arith.mulf %5, %5 : vector<16x128xf32>
    %cst_4 = arith.constant dense<0.000000e+00> : vector<16x128xf32>
    %7 = tpu.matmul %6, %1, %cst_4 {dimension_numbers = #tpu.dot_dimension_numbers<[1], [0], [0], [1], [0, 0, 1, 1], [], []>} : vector<16x128xf32>, vector<128x128xf32>, vector<16x128xf32> -> vector<16x128xf32>
    %cst_5 = arith.constant 0.0322580636 : f32
    %8 = vector.broadcast %cst_5 : f32 to vector<16x128xf32>
    %9 = arith.mulf %7, %8 : vector<16x128xf32>
    %10 = math.sqrt %9 : vector<16x128xf32>
    %cst_6 = arith.constant 9.99999997E-7 : f32
    %11 = vector.broadcast %cst_6 : f32 to vector<16x128xf32>
    %12 = arith.addf %10, %11 : vector<16x128xf32>
    %13 = tpu.reciprocal %12 : vector<16x128xf32> -> vector<16x128xf32>
    %14 = arith.mulf %5, %13 : vector<16x128xf32>
    %c0_7 = arith.constant 0 : index
    %c0_8 = arith.constant 0 : index
    %15 = vector.load %arg2[%c0_7, %c0_8] : memref<1x128xf32, #tpu.memory_space<vmem>>, vector<1x128xf32>
    %16 = vector.broadcast %15 : vector<1x128xf32> to vector<16x128xf32>
    %17 = arith.mulf %14, %16 : vector<16x128xf32>
    %c0_9 = arith.constant 0 : index
    %c0_10 = arith.constant 0 : index
    %18 = vector.load %arg3[%c0_9, %c0_10] : memref<1x128xf32, #tpu.memory_space<vmem>>, vector<1x128xf32>
    %19 = vector.broadcast %18 : vector<1x128xf32> to vector<16x128xf32>
    %20 = arith.addf %17, %19 : vector<16x128xf32>
    %c0_11 = arith.constant 0 : index
    %c0_12 = arith.constant 0 : index
    %21 = vector.load %arg5[%c0_11, %c0_12] : memref<16x128xf32, #tpu.memory_space<vmem>>, vector<16x128xf32>
    tpu.vector_store %arg5[%c0_11, %c0_12], %20 {strides = array<i32>} : memref<16x128xf32, #tpu.memory_space<vmem>>, vector<16x128xf32>,
    return
  }
  func.func @transform_0(%arg0: i32) -> (i32, i32) {
    %c0_i32 = arith.constant 0 : i32
    %c0_i32_0 = arith.constant 0 : i32
    return %arg0, %c0_i32 : i32, i32
  }
  func.func @transform_1(%arg0: i32) -> (i32, i32) {
    %c0_i32 = arith.constant 0 : i32
    %c0_i32_0 = arith.constant 0 : i32
    %c0_i32_1 = arith.constant 0 : i32
    return %c0_i32, %c0_i32_0 : i32, i32
  }
  func.func @transform_2(%arg0: i32) -> (i32, i32) {
    %c0_i32 = arith.constant 0 : i32
    %c0_i32_0 = arith.constant 0 : i32
    %c0_i32_1 = arith.constant 0 : i32
    return %c0_i32, %c0_i32_0 : i32, i32
  }
  func.func @transform_3(%arg0: i32) -> (i32, i32) {
    %c0_i32 = arith.constant 0 : i32
    %c0_i32_0 = arith.constant 0 : i32
    %c0_i32_1 = arith.constant 0 : i32
    return %c0_i32, %c0_i32_0 : i32, i32
  }
  func.func @transform_4(%arg0: i32) -> (i32, i32) {
    %c0_i32 = arith.constant 0 : i32
    %c0_i32_0 = arith.constant 0 : i32
    return %arg0, %c0_i32 : i32, i32
  }
}

</mosaic_0001>

<bundles_post_ra>
// kernel: tpu_custom_call.1
= control target key start
LH: loop header
LB: loop body
LE: loop exit
PB: predicated region body
PF: predicated region fallthrough
CT: control target
= control target key end

     0   :  { %9 = vsyncpa [#allocation3], 0  ;;  %s525_s0 = inlined_call_operand.hbm [shape: f32[16,128], index: 0, kind: input, shape index: {}]   ;;  %s526_s1 = inlined_call_operand.vmem [shape: f32[1,128], index: 1, kind: input, shape index: {}]   ;;  %s527_s2 = inlined_call_operand.vmem [shape: f32[1,128], index: 2, kind: input, shape index: {}]   ;;  %s528_s3 = inlined_call_operand.hbm [shape: f32[128,128], index: 3, kind: input, shape index: {}]   ;;  %s529_s4 = inlined_call_operand.hbm [shape: f32[16,128], index: 4, kind: output, shape index: {}]  }
   0x1   :  { %10 = vsyncpa [#allocation6], 0 }
   0x2   :  { %11 = vsyncpa [#allocation4], 0  ;;  %s467_s15 = smov [#allocation2]  }
   0x3   :  { %s17_s16 = sshll.u32 %s467_s15, 4  ;;  %s18_s16 = int_to_ptr.vmem [resolvable:$true] %s17_s16 }
   0x4   :  { %s409_s17 = scalar_lea.vmem %s18_s16, 256  ;;  %p414_p1 = scmp.lt.s32.totalorder %s18_s16, %s18_s16 }
   0x5   :  { %p410_p0 = scmp.ne.s32.totalorder %s18_s16, %s409_s17  ;;  %p415_p2 = scmp.lt.s32.totalorder %s409_s17, %s409_s17 }
   0x7   :  { %p416_p3 = por %p415_p2, %p414_p1 }
   0x9   :  { %p417_p4 = pnand %p416_p3, %p410_p0 }
   0xb   :  { %420 = shalt.err (!%p417_p4)
}
   0xc   :  { %s468_s18 = smov 128   ;;  %s469_s19 = smov 8  }
   0xd   :  { %23 = dma.hbm_to_vmem [thread:$0]  %s525_s0, 256, %s18_s16, [#allocation3], %s468_s18, %s468_s18, %s469_s19  }
   0xe   :  { %s470_s22 = smov [#allocation5]  }
   0xf   :  { %s33_s23 = sshll.u32 %s470_s22, 4  ;;  %s34_s23 = int_to_ptr.vmem [resolvable:$true] %s33_s23 }
  0x10   :  { %s429_s24 = scalar_lea.vmem %s34_s23, 2048  ;;  %p434_p6 = scmp.lt.s32.totalorder %s34_s23, %s34_s23 }
  0x11   :  { %p430_p5 = scmp.ne.s32.totalorder %s34_s23, %s429_s24  ;;  %p435_p7 = scmp.lt.s32.totalorder %s429_s24, %s429_s24 }
  0x13   :  { %p436_p8 = por %p435_p7, %p434_p6 }
  0x15   :  { %p437_p9 = pnand %p436_p8, %p430_p5 }
  0x17   :  { %440 = shalt.err (!%p437_p9)
}
  0x18   :  { %39 = dma.hbm_to_vmem [thread:$0]  %s528_s3, 2048, %s34_s23, [#allocation6], %s468_s18, %s468_s18, %s469_s19  }
  0x19   :  { %461 = dma.done.wait [#allocation3], 256  }
  0x1a   :  { %462 = vsyncadd [#allocation3], 4294967040 }
  0x1b   :  { %463 = dma.done.wait [#allocation6], 2048  }
  0x1c   :  { %464 = vsyncadd [#allocation6], 4294965248  ;;  %v63_v0 = vld [vmem:[#allocation5 + $0x78] sm:$0xff]  ;;  %v62_v1 = vld [vmem:[#allocation5 + $0x70] sm:$0xff]  ;;  %s471_s29 = smov [#allocation7]  }
  0x1d   :  { %318 = vmatprep.subr.mxu0 %v63_v0  ;;  %353 = vmatprep.subr.mxu1 %v63_v0  ;;  %v61_v2 = vld [vmem:[#allocation5 + $0x68] sm:$0xff]  ;;  %v60_v3 = vld [vmem:[#allocation5 + $0x60] sm:$0xff]  ;;  %v509_v4 = vld [vmem:[#allocation2] sm:$0xff]  ;;  %s267_s30 = sshll.u32 %s471_s29, 4  ;;  %s268_s30 = int_to_ptr.vmem [resolvable:$true] %s267_s30 }
  0x1e   :  { %319 = vmatpush3.msra.mxu0 %v63_v0  ;;  %354 = vmatpush3.msra.mxu1 %v63_v0  ;;  %v59_v5 = vld [vmem:[#allocation5 + $0x58] sm:$0xff]  ;;  %v58_v6 = vld [vmem:[#allocation5 + $0x50] sm:$0xff]  ;;  %v57_v7 = vld [vmem:[#allocation5 + $0x48] sm:$0xff]  ;;  %s441_s5 = scalar_lea.vmem %s268_s30, 256  ;;  %p446_p11 = scmp.lt.s32.totalorder %s268_s30, %s268_s30 }
  0x1f   :  { %320 = vmatprep.subr.mxu0 %v62_v1  ;;  %355 = vmatprep.subr.mxu1 %v62_v1  ;;  %v56_v8 = vld [vmem:[#allocation5 + $0x40] sm:$0xff]  ;;  %v55_v9 = vld [vmem:[#allocation5 + $0x38] sm:$0xff]  ;;  %v54_v10 = vld [vmem:[#allocation5 + $0x30] sm:$0xff]  ;;  %p442_p10 = scmp.ne.s32.totalorder %s268_s30, %s441_s5  ;;  %p447_p12 = scmp.lt.s32.totalorder %s441_s5, %s441_s5 }
  0x20   :  { %321 = vmatpush3.msra.mxu0 %v62_v1  ;;  %356 = vmatpush3.msra.mxu1 %v62_v1  ;;  %v53_v11 = vld [vmem:[#allocation5 + $0x28] sm:$0xff]  ;;  %v52_v12 = vld [vmem:[#allocation5 + $0x20] sm:$0xff]  ;;  %v51_v13 = vld [vmem:[#allocation5 + $0x18] sm:$0xff] }
  0x21   :  { %322 = vmatprep.subr.mxu0 %v61_v2  ;;  %357 = vmatprep.subr.mxu1 %v61_v2  ;;  %v50_v14 = vld [vmem:[#allocation5 + $0x10] sm:$0xff]  ;;  %v49_v15 = vld [vmem:[#allocation5 + $0x8] sm:$0xff]  ;;  %v48_v16 = vld [vmem:[#allocation5] sm:$0xff]  ;;  %p448_p13 = por %p447_p12, %p446_p11 }
  0x22   :  { %323 = vmatpush3.msra.mxu0 %v61_v2  ;;  %350 = vmatprep.mubr.f32.mxu0 %v509_v4  ;;  %v47_v17 = vld [vmem:[#allocation2 + $0x8] sm:$0xff]  ;;  %v280_v43 = vld [vmem:[%s526_s1] ss:$0 sm:$0xff] }
  0x23   :  { %324 = vmatprep.subr.mxu0 %v60_v3  ;;  %358 = vmatpush3.msra.mxu1 %v61_v2  ;;  %v281_v45 = vld [vmem:[%s527_s2] ss:$0 sm:$0xff]  ;;  %p449_p0 = pnand %p448_p13, %p442_p10 }
  0x24   :  { %325 = vmatpush3.msra.mxu0 %v60_v3  ;;  %359 = vmatprep.subr.mxu1 %v60_v3 }
  0x25   :  { %326 = vmatprep.subr.mxu0 %v59_v5  ;;  %360 = vmatpush3.msra.mxu1 %v60_v3 }
  0x26   :  { %327 = vmatpush3.msra.mxu0 %v59_v5  ;;  %361 = vmatprep.subr.mxu1 %v59_v5 }
  0x27   :  { %328 = vmatprep.subr.mxu0 %v58_v6  ;;  %362 = vmatpush3.msra.mxu1 %v59_v5 }
  0x28   :  { %329 = vmatpush3.msra.mxu0 %v58_v6  ;;  %363 = vmatprep.subr.mxu1 %v58_v6 }
  0x29   :  { %330 = vmatprep.subr.mxu0 %v57_v7  ;;  %364 = vmatpush3.msra.mxu1 %v58_v6 }
  0x2a   :  { %331 = vmatpush3.msra.mxu0 %v57_v7  ;;  %365 = vmatprep.subr.mxu1 %v57_v7 }
  0x2b   :  { %332 = vmatprep.subr.mxu0 %v56_v8  ;;  %366 = vmatpush3.msra.mxu1 %v57_v7 }
  0x2c   :  { %333 = vmatpush3.msra.mxu0 %v56_v8  ;;  %367 = vmatprep.subr.mxu1 %v56_v8 }
  0x2d   :  { %334 = vmatprep.subr.mxu0 %v55_v9  ;;  %368 = vmatpush3.msra.mxu1 %v56_v8 }
  0x2e   :  { %335 = vmatpush3.msra.mxu0 %v55_v9  ;;  %369 = vmatprep.subr.mxu1 %v55_v9 }
  0x2f   :  { %336 = vmatprep.subr.mxu0 %v54_v10  ;;  %370 = vmatpush3.msra.mxu1 %v55_v9 }
  0x30   :  { %337 = vmatpush3.msra.mxu0 %v54_v10  ;;  %371 = vmatprep.subr.mxu1 %v54_v10 }
  0x31   :  { %338 = vmatprep.subr.mxu0 %v53_v11  ;;  %372 = vmatpush3.msra.mxu1 %v54_v10 }
  0x32   :  { %339 = vmatpush3.msra.mxu0 %v53_v11  ;;  %373 = vmatprep.subr.mxu1 %v53_v11 }
  0x33   :  { %340 = vmatprep.subr.mxu0 %v52_v12  ;;  %374 = vmatpush3.msra.mxu1 %v53_v11 }
  0x34   :  { %341 = vmatpush3.msra.mxu0 %v52_v12  ;;  %375 = vmatprep.subr.mxu1 %v52_v12 }
  0x35   :  { %342 = vmatprep.subr.mxu0 %v51_v13  ;;  %376 = vmatpush3.msra.mxu1 %v52_v12 }
  0x36   :  { %343 = vmatpush3.msra.mxu0 %v51_v13  ;;  %377 = vmatprep.subr.mxu1 %v51_v13 }
  0x37   :  { %344 = vmatprep.subr.mxu0 %v50_v14  ;;  %378 = vmatpush3.msra.mxu1 %v51_v13 }
  0x38   :  { %345 = vmatpush3.msra.mxu0 %v50_v14  ;;  %379 = vmatprep.subr.mxu1 %v50_v14 }
  0x39   :  { %346 = vmatprep.subr.mxu0 %v49_v15  ;;  %380 = vmatpush3.msra.mxu1 %v50_v14 }
  0x3a   :  { %347 = vmatpush3.msra.mxu0 %v49_v15  ;;  %381 = vmatprep.subr.mxu1 %v49_v15 }
  0x3b   :  { %348 = vmatprep.subr.mxu0 %v48_v16  ;;  %382 = vmatpush3.msra.mxu1 %v49_v15 }
  0x3c   :  { %349 = vmatpush3.msra.mxu0 %v48_v16  ;;  %383 = vmatprep.subr.mxu1 %v48_v16 }
  0x3d   :  { %351 = vmatmul.mubr.f32.vlgmr.msra.gmra.mxu0 %v47_v17  ;;  %384 = vmatpush3.msra.mxu1 %v48_v16 }
  0xfd   :  { %v352_v18 = vpop.f32.mrf.mxu0 }
  0xfe   :  { %v140_v19 = vmul.f32 0.03125, %v352_v18 }
  0xff   :  { %v130_v20 = vpop.f32.mrf.mxu0 }
 0x100   :  { %v139_v21 = vmul.f32 0.03125, %v130_v20  ;;  %v142_v22 = vsub.f32 %v47_v17, %v140_v19 }
 0x102   :  { %v141_v23 = vsub.f32 %v509_v4, %v139_v21  ;;  %v144_v25 = vmul.f32 %v142_v22, %v142_v22 }
 0x104   :  { %v143_v24 = vmul.f32 %v141_v23, %v141_v23 }
 0x106   :  { %385 = vmatprep.mubr.f32.mxu1 %v143_v24 }
 0x107   :  { %386 = vmatmul.mubr.f32.vlgmr.msra.gmra.mxu1 %v144_v25 }
 0x1c7   :  { %v387_v26 = vpop.f32.mrf.mxu1 }
 0x1c8   :  { %v221_v27 = vmul.f32 0.032258064, %v387_v26 }
 0x1c9   :  { %v211_v28 = vpop.f32.mrf.mxu1 }
 0x1ca   :  { %393 = vrsqrt.f32 %v221_v27  ;;  %v220_v29 = vmul.f32 0.032258064, %v211_v28  ;;  %vm231_vm0 = vcmp.eq.f32.partialorder %v221_v27, inf  ;;  %v234_v32 = vand.u32 2147483648, %v221_v27 }
 0x1cb   :  { %vm233_vm1 = vcmp.eq.f32.partialorder %v221_v27, 0.0 }
 0x1cc   :  { %395 = vrsqrt.f32 %v220_v29  ;;  %vm224_vm2 = vcmp.eq.f32.partialorder %v220_v29, inf  ;;  %v227_v38 = vand.u32 2147483648, %v220_v29  ;;  %vm226_vm3 = vcmp.eq.f32.partialorder %v220_v29, 0.0 }
 0x1d7   :  { %v394_v30 = vpop.eup %393 }
 0x1d8   :  { %v230_v31 = vmul.f32 %v394_v30, %v221_v27 }
 0x1d9   :  { %v396_v33 = vpop.eup %395 }
 0x1da   :  { %v232_v34 = vsel %vm231_vm0, %v221_v27, %v230_v31  ;;  %v223_v36 = vmul.f32 %v396_v33, %v220_v29 }
 0x1db   :  { %v235_v35 = vsel %vm233_vm1, %v234_v32, %v232_v34 }
 0x1dc   :  { %v237_v37 = vadd.f32 1e-06, %v235_v35  ;;  %v225_v39 = vsel %vm224_vm2, %v220_v29, %v223_v36 }
 0x1dd   :  { %v228_v40 = vsel %vm226_vm3, %v227_v38, %v225_v39 }
 0x1de   :  { %397 = vrcp.f32 %v237_v37  ;;  %v236_v41 = vadd.f32 1e-06, %v228_v40 }
 0x1e0   :  { %399 = vrcp.f32 %v236_v41 }
 0x1eb   :  { %v398_v42 = vpop.eup %397 }
 0x1ec   :  { %v241_v44 = vmul.f32 %v398_v42, %v142_v22 }
 0x1ed   :  { %v400_v46 = vpop.eup %399 }
 0x1ee   :  { %v250_v47 = vmul.f32 %v280_v43, %v241_v44  ;;  %v240_v48 = vmul.f32 %v400_v46, %v141_v23 }
 0x1f0   :  { %v259_v49 = vadd.f32 %v281_v45, %v250_v47  ;;  %v249_v50 = vmul.f32 %v280_v43, %v240_v48 }
 0x1f2   :  { %261 = vst [vmem:[#allocation7 + $0x8] sm:$0xff] %v259_v49  ;;  %v258_v51 = vadd.f32 %v281_v45, %v249_v50 }
 0x1f4   :  { %260 = vst [vmem:[#allocation7] sm:$0xff] %v258_v51 }
 0x1f5   :  { %452 = shalt.err (!%p449_p0)
}
 0x1f6   :  { %273 = dma.vmem_to_hbm [thread:$0]  %s268_s30, 256, %s529_s4, [#allocation4], %s468_s18, %s468_s18, %s469_s19  }
 0x1f7   :  { %465 = dma.done.wait [#allocation4], 256  }
 0x1f8   :  { %466 = vsyncadd [#allocation4], 4294967040 }
 0x1f9   :  { %277 = vsyncpa [#allocation3], 1 }
 0x1fa   :  { %278 = vsyncpa [#allocation6], 1 }
 0x1fb   :  { %279 = vsyncpa [#allocation4], 1 }

</bundles_post_ra>
